<compile_context>
chip_gen: v7x
topology: tpu7x:2x2x1
jax: 0.10.0
libtpu: 0.0.40
codegen_flags: <defaults>
</compile_context>

<pallas_src>
import functools

import jax
import jax.numpy as jnp
from jax import lax
from jax.experimental import pallas as pl
from jax.experimental.pallas import tpu as pltpu


def _gelu_tanh(x):
    # DeepSpeed's gelu kernel (tanh approximation).
    c = 0.7978845608028654  # sqrt(2/pi)
    return 0.5 * x * (1.0 + jnp.tanh(c * (x + 0.044715 * x * x * x)))


def _round_up(n, m):
    return ((n + m - 1) // m) * m


def _vmem_capacity_bytes():
    """Physical VMEM per core (generation-aware: v7x has 64 MiB, not 128)."""
    try:
        cap = getattr(pltpu.get_tpu_info(), "vmem_capacity_bytes", None)
        if cap:
            return int(cap)
    except Exception:
        pass
    return 128 * 1024 * 1024


def _num_tensorcores():
    """Best-effort TensorCores-per-chip detection (megacore / dual-TC)."""
    try:
        dev = jax.devices()[0]
        n = getattr(dev, "num_cores", None)
        if n:
            return max(1, min(int(n), 2))
        kind = str(getattr(dev, "device_kind", "")).lower()
        if any(tag in kind for tag in ("v4", "v5p", "7x", "v7")):
            return 2
    except Exception:
        pass
    return 1


def _vmem_estimate(tm, ti, H, asz, wsz):
    """Rough VMEM footprint of one grid step (double-buffered blocks + scratch)."""
    chunk = ti // 2 if ti % 256 == 0 else ti
    blocks = 2 * (2 * tm * H * asz        # x + residual blocks (double-buffered)
                  + 2 * ti * H * wsz      # inter_w^T + output_w^T tiles
                  + ti * wsz              # inter_b tile
                  + 8 * H * 4)            # packed f32 constants
    blocks += 2 * tm * H * asz            # output block (double-buffered)
    scratch = tm * H * (wsz + 4 + 4)      # ln cache, residual_add, f32 accumulator
    temps = tm * chunk * (4 + wsz)        # in-kernel intermediate (f32 + cast copy)
    return blocks + scratch + temps + (2 << 20)


def _choose_tiles(M, H, I, asz, wsz, budget, num_cores, tm_max, ti_max, ti_min):
    Mp8 = _round_up(max(M, 1), 8)
    Ip128 = _round_up(max(I, 1), 128)
    ti_hi = max(128, min(_round_up(ti_max, 128), Ip128))
    ti_lo = max(128, min(_round_up(ti_min, 128), ti_hi))

    # tm sets arithmetic intensity against the re-streamed weights: maximise it
    # first (assuming the smallest ti), ideally covering all of M in one pass,
    # but keep >= num_cores M tiles so the parallel axis shards across TCs.
    n_m_min = num_cores if Mp8 >= 8 * num_cores else 1
    tm = max(8, min(_round_up(tm_max, 8), _round_up(pl.cdiv(Mp8, n_m_min), 8)))
    while tm > 8 and _vmem_estimate(tm, ti_lo, H, asz, wsz) > budget:
        tm -= 8

    # ti does not change arithmetic intensity: grow it with leftover VMEM only.
    ti = ti_hi
    while ti > ti_lo and _vmem_estimate(tm, ti, H, asz, wsz) > budget:
        ti -= 128

    # Rebalance both tiles so zero padding is minimal for the chosen tile counts.
    n_m = pl.cdiv(Mp8, tm)
    tm = _round_up(pl.cdiv(Mp8, n_m), 8)
    n_i = pl.cdiv(Ip128, ti)
    ti = _round_up(pl.cdiv(Ip128, n_i), 128)
    return tm, ti


def deepspeed_mlp_kernel(x_ref, res_ref, consts_ref, inter_w_ref, inter_b_ref,
                         out_w_ref, o_ref, ln_sc, resadd_sc, acc_sc,
                         *, eps, chunk):
    # Grid: (M tiles [parallel], I tiles [arbitrary, LAST]).  The accumulator
    # init/finalize protocol below requires the I axis to run sequentially as
    # the innermost grid axis — do not reorder or mark it "parallel".
    j = pl.program_id(1)
    n_j = pl.num_programs(1)

    # ---- once per M tile: residual add + LayerNorm, cached in VMEM scratch ----
    @pl.when(j == 0)
    def _init():
        x = x_ref[...].astype(jnp.float32)
        r = res_ref[...].astype(jnp.float32)
        b = consts_ref[0:1, :]         # attn-output bias (f32)
        nw = consts_ref[1:2, :]        # attn_nw
        nb = consts_ref[2:3, :]        # attn_nb

        res_add = x + r + b

        # Single-pass LayerNorm stats: var = E[x^2] - E[x]^2 (one XLU pass less).
        mean = jnp.mean(res_add, axis=-1, keepdims=True)
        mean_sq = jnp.mean(res_add * res_add, axis=-1, keepdims=True)
        var = jnp.maximum(mean_sq - mean * mean, 0.0)
        ln = (res_add - mean) * lax.rsqrt(var + eps) * nw + nb

        resadd_sc[...] = res_add
        ln_sc[...] = ln.astype(ln_sc.dtype)
        acc_sc[...] = jnp.zeros_like(acc_sc)

    # ---- per I tile: GEMM1 -> bias + gelu -> GEMM2 accumulate ----------------
    # Static 2-way sub-chunk unroll: gelu/bias (VPU/EUP) of one chunk overlaps
    # the MXU work of the other chunk.
    ti = inter_w_ref.shape[1]
    for c in range(ti // chunk):
        lo = c * chunk
        iw_c = inter_w_ref[:, lo:lo + chunk]                    # (H, chunk)
        ow_c = out_w_ref[lo:lo + chunk, :]                      # (chunk, H)
        ib_c = inter_b_ref[:, lo:lo + chunk].astype(jnp.float32)

        inter_c = jnp.dot(ln_sc[...], iw_c,
                          preferred_element_type=jnp.float32)   # (tm, chunk)
        inter_c = _gelu_tanh(inter_c + ib_c)
        acc_sc[...] += jnp.dot(inter_c.astype(ow_c.dtype), ow_c,
                               preferred_element_type=jnp.float32)

    # ---- finalize: + residual_add + output bias, cast, store -----------------
    @pl.when(j == n_j - 1)
    def _finalize():
        ob = consts_ref[3:4, :]        # output_b (f32)
        o_ref[...] = (acc_sc[...] + resadd_sc[...] + ob).astype(o_ref.dtype)


def deepspeed_mlp(x, residual, bias, attn_nw, attn_nb,
                  inter_w, inter_b, output_w, output_b, *,
                  eps=1e-12, weight_dtype=None,
                  row_tile_max=1024, inter_tile_max=2048, inter_tile_min=256):
    B, S, H = x.shape
    I = inter_w.shape[0]              # intermediate_size // mp_size
    M = B * S

    wdtype = jnp.dtype(weight_dtype) if weight_dtype is not None else inter_w.dtype
    asz = jnp.dtype(x.dtype).itemsize
    wsz = jnp.dtype(wdtype).itemsize

    # ---- generation-aware VMEM budget and tile selection ---------------------
    cap = _vmem_capacity_bytes()
    budget = int(cap * 0.72)
    num_cores = _num_tensorcores()
    tm, ti = _choose_tiles(M, H, I, asz, wsz, budget, num_cores,
                           row_tile_max, inter_tile_max, inter_tile_min)
    chunk = ti // 2 if ti % 256 == 0 else ti
    Mp = _round_up(M, tm)
    Ip = _round_up(I, ti)

    # ---- glue (in a real model do the transpose/cast once at weight load) ----
    x2 = x.reshape(M, H)
    r2 = residual.reshape(M, H)
    if Mp != M:
        x2 = jnp.pad(x2, ((0, Mp - M), (0, 0)))
        r2 = jnp.pad(r2, ((0, Mp - M), (0, 0)))

    iw_t = inter_w.T.astype(wdtype)           # (H, I): GEMM1 is plain (m,k)@(k,n)
    ow_t = output_w.T.astype(wdtype)          # (I, H): GEMM2 is plain (m,k)@(k,n)
    ib = inter_b.astype(wdtype)
    if Ip != I:
        iw_t = jnp.pad(iw_t, ((0, 0), (0, Ip - I)))
        ow_t = jnp.pad(ow_t, ((0, Ip - I), (0, 0)))
        ib = jnp.pad(ib, ((0, Ip - I),))
    ib2 = ib.reshape(1, Ip)

    # Pack the four (H,) constants into one (8, H) f32 block:
    # rows = [attn-output bias, attn_nw, attn_nb, output_b, 0, 0, 0, 0].
    consts = jnp.stack([bias, attn_nw, attn_nb, output_b]).astype(jnp.float32)
    consts = jnp.pad(consts, ((0, 4), (0, 0)))

    est = _vmem_estimate(tm, ti, H, asz, wsz)
    vmem_limit = min(int(cap * 0.9), max(int(est * 1.5), 32 * 1024 * 1024))

    grid = (Mp // tm, Ip // ti)   # I axis LAST: it is the accumulation axis.

    out = pl.pallas_call(
        functools.partial(deepspeed_mlp_kernel, eps=eps, chunk=chunk),
        out_shape=jax.ShapeDtypeStruct((Mp, H), x.dtype),
        grid_spec=pltpu.PrefetchScalarGridSpec(
            num_scalar_prefetch=0,
            grid=grid,
            in_specs=[
                pl.BlockSpec((tm, H), lambda i, j: (i, 0)),    # input rows
                pl.BlockSpec((tm, H), lambda i, j: (i, 0)),    # residual rows
                pl.BlockSpec((8, H), lambda i, j: (0, 0)),     # packed constants
                pl.BlockSpec((H, ti), lambda i, j: (0, j)),    # inter_w^T I-tile
                pl.BlockSpec((1, ti), lambda i, j: (0, j)),    # inter_b I-tile
                pl.BlockSpec((ti, H), lambda i, j: (j, 0)),    # output_w^T I-tile
            ],
            out_specs=pl.BlockSpec((tm, H), lambda i, j: (i, 0)),
            scratch_shapes=[
                pltpu.VMEM((tm, H), wdtype),       # LayerNorm output cache
                pltpu.VMEM((tm, H), jnp.float32),  # residual_add cache
                pltpu.VMEM((tm, H), jnp.float32),  # f32 output accumulator
            ]),
        compiler_params=pltpu.CompilerParams(
            # I axis must stay "arbitrary" (sequential) for the accumulator
            # protocol; the M axis shards across TensorCores on dual-TC chips.
            dimension_semantics=("parallel", "arbitrary"),
            vmem_limit_bytes=vmem_limit),
    )(x2, r2, consts, iw_t, ib2, ow_t)

    return out[:M].reshape(B, S, H)


def deepspeed_mlp_ref(x, residual, bias, attn_nw, attn_nb,
                      inter_w, inter_b, output_w, output_b, *, eps=1e-12):
    res_add = x + residual + bias
    mean = jnp.mean(res_add, axis=-1, keepdims=True)
    var = jnp.mean(jnp.square(res_add - mean), axis=-1, keepdims=True)
    ln = (res_add - mean) * lax.rsqrt(var + eps) * attn_nw + attn_nb
    inter = _gelu_tanh(ln @ inter_w.T + inter_b)
    return inter @ output_w.T + res_add + output_b


def _run_case(key, B, S, H, I, eps, dtype, weight_dtype=None,
              row_tile_max=1024, inter_tile_max=2048, atol=1e-4, rtol=1e-4):
    ks = jax.random.split(key, 9)
    x = jax.random.normal(ks[0], (B, S, H), dtype)
    residual = jax.random.normal(ks[1], (B, S, H), dtype)
    bias = 0.02 * jax.random.normal(ks[2], (H,), dtype)
    attn_nw = 1.0 + 0.02 * jax.random.normal(ks[3], (H,), dtype)
    attn_nb = 0.02 * jax.random.normal(ks[4], (H,), dtype)
    inter_w = 0.02 * jax.random.normal(ks[5], (I, H), dtype)    # [inter, hidden]
    inter_b = 0.02 * jax.random.normal(ks[6], (I,), dtype)
    output_w = 0.02 * jax.random.normal(ks[7], (H, I), dtype)   # [hidden, inter]
    output_b = 0.02 * jax.random.normal(ks[8], (H,), dtype)

    out = deepspeed_mlp(x, residual, bias, attn_nw, attn_nb,
                        inter_w, inter_b, output_w, output_b, eps=eps,
                        weight_dtype=weight_dtype,
                        row_tile_max=row_tile_max, inter_tile_max=inter_tile_max)
    out = jax.block_until_ready(out)

    iw, ib, ow = inter_w, inter_b, output_w
    if weight_dtype is not None:
        iw = iw.astype(weight_dtype).astype(jnp.float32)
        ib = ib.astype(weight_dtype).astype(jnp.float32)
        ow = ow.astype(weight_dtype).astype(jnp.float32)
    ref = deepspeed_mlp_ref(x, residual, bias, attn_nw, attn_nb,
                            iw, ib, ow, output_b, eps=eps)
    assert out.shape == (B, S, H)
    assert jnp.allclose(out, ref, atol=atol, rtol=rtol), \
        f"mismatch vs reference (B={B}, S={S}, H={H}, I={I}, wdtype={weight_dtype})"


if __name__ == "__main__":
    eps = 1e-12
    key = jax.random.PRNGKey(0)
    k1, k2, k3 = jax.random.split(key, 3)

    # Small config matching the module spec: batch=2, seq=8, hidden=32, I=4*H.
    _run_case(k1, B=2, S=8, H=32, I=4 * 32, eps=eps, dtype=jnp.float32)

    # Ragged M / ragged I: exercises zero padding + single-tile accumulation.
    _run_case(k2, B=3, S=7, H=128, I=640, eps=eps, dtype=jnp.float32)

    # Multi M-tile / multi I-tile / 2-chunk unroll / bf16 weight fast path.
    _run_case(k3, B=2, S=16, H=128, I=512, eps=eps, dtype=jnp.float32,
              weight_dtype=jnp.bfloat16, row_tile_max=16, inter_tile_max=256,
              atol=2e-2, rtol=2e-2)

    print("KERNEL_OK")
</pallas_src>

<mosaic_0001>
module attributes {stable_mosaic.version = 11 : i64} {
  func.func @deepspeed_mlp_kernel(%arg0: i32, %arg1: i32, %arg2: memref<16x32xf32, #tpu.memory_space<vmem>>, %arg3: memref<16x32xf32, #tpu.memory_space<vmem>>, %arg4: memref<8x32xf32, #tpu.memory_space<vmem>>, %arg5: memref<32x128xf32, #tpu.memory_space<vmem>>, %arg6: memref<1x128xf32, #tpu.memory_space<vmem>>, %arg7: memref<128x32xf32, #tpu.memory_space<vmem>>, %arg8: memref<16x32xf32, #tpu.memory_space<vmem>>, %arg9: memref<16x32xf32, #tpu.memory_space<vmem>>, %arg10: memref<16x32xf32, #tpu.memory_space<vmem>>, %arg11: memref<16x32xf32, #tpu.memory_space<vmem>>) attributes {dimension_semantics = [#tpu.dimension_semantics<parallel>, #tpu.dimension_semantics<arbitrary>], iteration_bounds = array<i64: 1, 1>, scalar_prefetch = 0 : i64, scratch_operands = 3 : i64, tpu.core_type = #tpu.core_type<tc>, window_params = [{transform_indices = @transform_0, window_bounds = array<i64: 16, 32>}, {transform_indices = @transform_1, window_bounds = array<i64: 16, 32>}, {pipeline_mode = #tpu.pipeline_mode<synchronous>, transform_indices = @transform_2, window_bounds = array<i64: 8, 32>}, {transform_indices = @transform_3, window_bounds = array<i64: 32, 128>}, {transform_indices = @transform_4, window_bounds = array<i64: 1, 128>}, {transform_indices = @transform_5, window_bounds = array<i64: 128, 32>}, {transform_indices = @transform_6, window_bounds = array<i64: 16, 32>}]} {
    %c0_i32 = arith.constant 0 : i32
    %0 = arith.cmpi eq, %arg1, %c0_i32 : i32
    %1 = arith.extui %0 : i1 to i32
    %c0_i32_0 = arith.constant 0 : i32
    %2 = arith.cmpi ne, %1, %c0_i32_0 : i32
    scf.if %2 {
      %c0_19 = arith.constant 0 : index
      %c0_20 = arith.constant 0 : index
      %30 = vector.load %arg2[%c0_19, %c0_20] : memref<16x32xf32, #tpu.memory_space<vmem>>, vector<16x32xf32>
      %c0_21 = arith.constant 0 : index
      %c0_22 = arith.constant 0 : index
      %31 = vector.load %arg3[%c0_21, %c0_22] : memref<16x32xf32, #tpu.memory_space<vmem>>, vector<16x32xf32>
      %c0_23 = arith.constant 0 : index
      %c0_24 = arith.constant 0 : index
      %32 = vector.load %arg4[%c0_23, %c0_24] : memref<8x32xf32, #tpu.memory_space<vmem>>, vector<1x32xf32>
      %c1 = arith.constant 1 : index
      %c0_25 = arith.constant 0 : index
      %33 = vector.load %arg4[%c1, %c0_25] : memref<8x32xf32, #tpu.memory_space<vmem>>, vector<1x32xf32>
      %c2 = arith.constant 2 : index
      %c0_26 = arith.constant 0 : index
      %34 = vector.load %arg4[%c2, %c0_26] : memref<8x32xf32, #tpu.memory_space<vmem>>, vector<1x32xf32>
      %35 = arith.addf %30, %31 : vector<16x32xf32>
      %36 = vector.broadcast %32 : vector<1x32xf32> to vector<16x32xf32>
      %37 = arith.addf %35, %36 : vector<16x32xf32>
      %cst_27 = arith.constant dense<0.000000e+00> : vector<16xf32>
      %38 = vector.multi_reduction <add>, %37, %cst_27 [1] : vector<16x32xf32> to vector<16xf32>
      %39 = vector.shape_cast %38 : vector<16xf32> to vector<16x1xf32>
      %cst_28 = arith.constant 3.200000e+01 : f32
      %40 = vector.broadcast %cst_28 : f32 to vector<16x1xf32>
      %41 = arith.divf %39, %40 : vector<16x1xf32>
      %42 = arith.mulf %37, %37 : vector<16x32xf32>
      %cst_29 = arith.constant dense<0.000000e+00> : vector<16xf32>
      %43 = vector.multi_reduction <add>, %42, %cst_29 [1] : vector<16x32xf32> to vector<16xf32>
      %44 = vector.shape_cast %43 : vector<16xf32> to vector<16x1xf32>
      %cst_30 = arith.constant 3.200000e+01 : f32
      %45 = vector.broadcast %cst_30 : f32 to vector<16x1xf32>
      %46 = arith.divf %44, %45 : vector<16x1xf32>
      %47 = arith.mulf %41, %41 : vector<16x1xf32>
      %48 = arith.subf %46, %47 : vector<16x1xf32>
      %cst_31 = arith.constant 0.000000e+00 : f32
      %49 = vector.broadcast %cst_31 : f32 to vector<16x1xf32>
      %50 = arith.maximumf %48, %49 : vector<16x1xf32>
      %51 = vector.broadcast %41 : vector<16x1xf32> to vector<16x32xf32>
      %52 = arith.subf %37, %51 : vector<16x32xf32>
      %cst_32 = arith.constant 9.99999996E-13 : f32
      %53 = vector.broadcast %cst_32 : f32 to vector<16x1xf32>
      %54 = arith.addf %50, %53 : vector<16x1xf32>
      %55 = math.rsqrt %54 : vector<16x1xf32>
      %56 = vector.broadcast %55 : vector<16x1xf32> to vector<16x32xf32>
      %57 = arith.mulf %52, %56 : vector<16x32xf32>
      %58 = vector.broadcast %33 : vector<1x32xf32> to vector<16x32xf32>
      %59 = arith.mulf %57, %58 : vector<16x32xf32>
      %60 = vector.broadcast %34 : vector<1x32xf32> to vector<16x32xf32>
      %61 = arith.addf %59, %60 : vector<16x32xf32>
      %c0_33 = arith.constant 0 : index
      %c0_34 = arith.constant 0 : index
      %62 = vector.load %arg10[%c0_33, %c0_34] : memref<16x32xf32, #tpu.memory_space<vmem>>, vector<16x32xf32>
      tpu.vector_store %arg10[%c0_33, %c0_34], %37 {strides = array<i32>} : memref<16x32xf32, #tpu.memory_space<vmem>>, vector<16x32xf32>,
      %c0_35 = arith.constant 0 : index
      %c0_36 = arith.constant 0 : index
      %63 = vector.load %arg9[%c0_35, %c0_36] : memref<16x32xf32, #tpu.memory_space<vmem>>, vector<16x32xf32>
      tpu.vector_store %arg9[%c0_35, %c0_36], %61 {strides = array<i32>} : memref<16x32xf32, #tpu.memory_space<vmem>>, vector<16x32xf32>,
      %cst_37 = arith.constant 0.000000e+00 : f32
      %64 = vector.broadcast %cst_37 : f32 to vector<16x32xf32>
      %c0_38 = arith.constant 0 : index
      %c0_39 = arith.constant 0 : index
      %65 = vector.load %arg11[%c0_38, %c0_39] : memref<16x32xf32, #tpu.memory_space<vmem>>, vector<16x32xf32>
      tpu.vector_store %arg11[%c0_38, %c0_39], %64 {strides = array<i32>} : memref<16x32xf32, #tpu.memory_space<vmem>>, vector<16x32xf32>,
    } else {
    }
    %c0 = arith.constant 0 : index
    %c0_1 = arith.constant 0 : index
    %3 = vector.load %arg5[%c0, %c0_1] : memref<32x128xf32, #tpu.memory_space<vmem>>, vector<32x128xf32>
    %c0_2 = arith.constant 0 : index
    %c0_3 = arith.constant 0 : index
    %4 = vector.load %arg7[%c0_2, %c0_3] : memref<128x32xf32, #tpu.memory_space<vmem>>, vector<128x32xf32>
    %c0_4 = arith.constant 0 : index
    %c0_5 = arith.constant 0 : index
    %5 = vector.load %arg6[%c0_4, %c0_5] : memref<1x128xf32, #tpu.memory_space<vmem>>, vector<1x128xf32>
    %c0_6 = arith.constant 0 : index
    %c0_7 = arith.constant 0 : index
    %6 = vector.load %arg9[%c0_6, %c0_7] : memref<16x32xf32, #tpu.memory_space<vmem>>, vector<16x32xf32>
    %cst = arith.constant dense<0.000000e+00> : vector<16x128xf32>
    %7 = tpu.matmul %6, %3, %cst {dimension_numbers = #tpu.dot_dimension_numbers<[1], [0], [0], [1], [0, 0, 1, 1], [], []>} : vector<16x32xf32>, vector<32x128xf32>, vector<16x128xf32> -> vector<16x128xf32>
    %8 = vector.broadcast %5 : vector<1x128xf32> to vector<16x128xf32>
    %9 = arith.addf %7, %8 : vector<16x128xf32>
    %cst_8 = arith.constant 5.000000e-01 : f32
    %10 = vector.broadcast %cst_8 : f32 to vector<16x128xf32>
    %11 = arith.mulf %10, %9 : vector<16x128xf32>
    %cst_9 = arith.constant 4.471500e-02 : f32
    %12 = vector.broadcast %cst_9 : f32 to vector<16x128xf32>
    %13 = arith.mulf %12, %9 : vector<16x128xf32>
    %14 = arith.mulf %13, %9 : vector<16x128xf32>
    %15 = arith.mulf %14, %9 : vector<16x128xf32>
    %16 = arith.addf %9, %15 : vector<16x128xf32>
    %cst_10 = arith.constant 0.797884583 : f32
    %17 = vector.broadcast %cst_10 : f32 to vector<16x128xf32>
    %18 = arith.mulf %17, %16 : vector<16x128xf32>
    %19 = math.tanh %18 : vector<16x128xf32>
    %cst_11 = arith.constant 1.000000e+00 : f32
    %20 = vector.broadcast %cst_11 : f32 to vector<16x128xf32>
    %21 = arith.addf %20, %19 : vector<16x128xf32>
    %22 = arith.mulf %11, %21 : vector<16x128xf32>
    %c0_12 = arith.constant 0 : index
    %c0_13 = arith.constant 0 : index
    %23 = vector.load %arg11[%c0_12, %c0_13] : memref<16x32xf32, #tpu.memory_space<vmem>>, vector<16x32xf32>
    %cst_14 = arith.constant dense<0.000000e+00> : vector<16x32xf32>
    %24 = tpu.matmul %22, %4, %cst_14 {dimension_numbers = #tpu.dot_dimension_numbers<[1], [0], [0], [1], [0, 0, 1, 1], [], []>} : vector<16x128xf32>, vector<128x32xf32>, vector<16x32xf32> -> vector<16x32xf32>
    %25 = arith.addf %23, %24 : vector<16x32xf32>
    %c0_15 = arith.constant 0 : index
    %c0_16 = arith.constant 0 : index
    %26 = vector.load %arg11[%c0_15, %c0_16] : memref<16x32xf32, #tpu.memory_space<vmem>>, vector<16x32xf32>
    tpu.vector_store %arg11[%c0_15, %c0_16], %25 {strides = array<i32>} : memref<16x32xf32, #tpu.memory_space<vmem>>, vector<16x32xf32>,
    %c0_i32_17 = arith.constant 0 : i32
    %27 = arith.cmpi eq, %arg1, %c0_i32_17 : i32
    %28 = arith.extui %27 : i1 to i32
    %c0_i32_18 = arith.constant 0 : i32
    %29 = arith.cmpi ne, %28, %c0_i32_18 : i32
    scf.if %29 {
      %c3 = arith.constant 3 : index
      %c0_19 = arith.constant 0 : index
      %30 = vector.load %arg4[%c3, %c0_19] : memref<8x32xf32, #tpu.memory_space<vmem>>, vector<1x32xf32>
      %c0_20 = arith.constant 0 : index
      %c0_21 = arith.constant 0 : index
      %31 = vector.load %arg11[%c0_20, %c0_21] : memref<16x32xf32, #tpu.memory_space<vmem>>, vector<16x32xf32>
      %c0_22 = arith.constant 0 : index
      %c0_23 = arith.constant 0 : index
      %32 = vector.load %arg10[%c0_22, %c0_23] : memref<16x32xf32, #tpu.memory_space<vmem>>, vector<16x32xf32>
      %33 = arith.addf %31, %32 : vector<16x32xf32>
      %34 = vector.broadcast %30 : vector<1x32xf32> to vector<16x32xf32>
      %35 = arith.addf %33, %34 : vector<16x32xf32>
      %c0_24 = arith.constant 0 : index
      %c0_25 = arith.constant 0 : index
      %36 = vector.load %arg8[%c0_24, %c0_25] : memref<16x32xf32, #tpu.memory_space<vmem>>, vector<16x32xf32>
      tpu.vector_store %arg8[%c0_24, %c0_25], %35 {strides = array<i32>} : memref<16x32xf32, #tpu.memory_space<vmem>>, vector<16x32xf32>,
    } else {
    }
    return
  }
  func.func @transform_0(%arg0: i32, %arg1: i32) -> (i32, i32) {
    %c0_i32 = arith.constant 0 : i32
    %c0_i32_0 = arith.constant 0 : i32
    return %arg0, %c0_i32 : i32, i32
  }
  func.func @transform_1(%arg0: i32, %arg1: i32) -> (i32, i32) {
    %c0_i32 = arith.constant 0 : i32
    %c0_i32_0 = arith.constant 0 : i32
    return %arg0, %c0_i32 : i32, i32
  }
  func.func @transform_2(%arg0: i32, %arg1: i32) -> (i32, i32) {
    %c0_i32 = arith.constant 0 : i32
    %c0_i32_0 = arith.constant 0 : i32
    %c0_i32_1 = arith.constant 0 : i32
    return %c0_i32, %c0_i32_0 : i32, i32
  }
  func.func @transform_3(%arg0: i32, %arg1: i32) -> (i32, i32) {
    %c0_i32 = arith.constant 0 : i32
    %c0_i32_0 = arith.constant 0 : i32
    return %c0_i32, %arg1 : i32, i32
  }
  func.func @transform_4(%arg0: i32, %arg1: i32) -> (i32, i32) {
    %c0_i32 = arith.constant 0 : i32
    %c0_i32_0 = arith.constant 0 : i32
    return %c0_i32, %arg1 : i32, i32
  }
  func.func @transform_5(%arg0: i32, %arg1: i32) -> (i32, i32) {
    %c0_i32 = arith.constant 0 : i32
    %c0_i32_0 = arith.constant 0 : i32
    return %arg1, %c0_i32 : i32, i32
  }
  func.func @transform_6(%arg0: i32, %arg1: i32) -> (i32, i32) {
    %c0_i32 = arith.constant 0 : i32
    %c0_i32_0 = arith.constant 0 : i32
    return %arg0, %c0_i32 : i32, i32
  }
}

</mosaic_0001>

<bundles_post_ra>
// kernel: tpu_custom_call.1
= control target key start
LH: loop header
LB: loop body
LE: loop exit
PB: predicated region body
PF: predicated region fallthrough
CT: control target
= control target key end

     0   :  { %s646_s0 = inlined_call_operand.vmem [shape: f32[16,32], index: 0, kind: input, shape index: {}]   ;;  %s647_s1 = inlined_call_operand.vmem [shape: f32[16,32], index: 1, kind: input, shape index: {}]   ;;  %s648_s2 = inlined_call_operand.vmem [shape: f32[8,32], index: 2, kind: input, shape index: {}]   ;;  %s649_s3 = inlined_call_operand.vmem [shape: f32[32,128], index: 3, kind: input, shape index: {}]   ;;  %s650_s4 = inlined_call_operand.vmem [shape: f32[1,128], index: 4, kind: input, shape index: {}]   ;;  %s651_s5 = inlined_call_operand.vmem [shape: f32[128,32], index: 5, kind: input, shape index: {}]   ;;  %s652_s6 = inlined_call_operand.hbm [shape: f32[16,32], index: 6, kind: output, shape index: {}]  }
   0x1   :  { %v28_v0 = vld [vmem:[%s646_s0] sm:$0xff]  ;;  %v29_v4 = vld [vmem:[%s646_s0 + $0x8] sm:$0xff] }
   0x2   :  { %v30_v1 = vld [vmem:[%s647_s1] sm:$0xff]  ;;  %v31_v5 = vld [vmem:[%s647_s1 + $0x8] sm:$0xff] }
   0x3   :  { %v339_v2 = vld [vmem:[%s648_s2] ss:$0 sm:$0xff]  ;;  %v35_v3 = vadd.f32 %v30_v1, %v28_v0 }
   0x4   :  { %11 = vsyncpa [#allocation6], 0  ;;  %vm43_vm0 = vcmask 261120   ;;  %v36_v6 = vadd.f32 %v31_v5, %v29_v4  ;;  %v95_v15 = vld [vmem:[%s649_s3] sm:$0xff]  ;;  %v96_v16 = vld [vmem:[%s649_s3 + $0x8] sm:$0xff]  ;;  %s493_s23 = smov [#allocation5]  }
   0x5   :  { %v41_v7 = vadd.f32 %v339_v2, %v35_v3  ;;  %v416_v17 = vpack.c.bf16 %v96_v16, %v95_v15  ;;  %v97_v18 = vld [vmem:[%s649_s3 + $0x10] sm:$0xff]  ;;  %v98_v19 = vld [vmem:[%s649_s3 + $0x18] sm:$0xff]  ;;  %v99_v21 = vld [vmem:[%s651_s5] sm:$0xff]  ;;  %s328_s24 = sshll.u32 %s493_s23, 4  ;;  %s329_s24 = int_to_ptr.vmem [resolvable:$true] %s328_s24 }
   0x6   :  { %v42_v8 = vadd.f32 %v339_v2, %v36_v6  ;;  %v420_v20 = vpack.c.bf16 %v98_v19, %v97_v18  ;;  %v100_v22 = vld [vmem:[%s651_s5 + $0x8] sm:$0xff]  ;;  %v340_v42 = vld [vmem:[%s648_s2 + $0x1] ss:$0 sm:$0xff]  ;;  %v341_v44 = vld [vmem:[%s648_s2 + $0x2] ss:$0 sm:$0xff]  ;;  %s468_s25 = scalar_lea.vmem %s329_s24, 256  ;;  %p473_p1 = scmp.lt.s32.totalorder %s329_s24, %s329_s24 }
   0x7   :  { %v44_v9 = vsel %vm43_vm0, %v41_v7, 0.0  ;;  %89 = vst.msk [vmem:[#allocation3] sm:$0xff] %vm43_vm0, %v41_v7  ;;  %v53_v10 = vmul.f32 %v41_v7, %v41_v7  ;;  %417 = vmatprep.subr.bf16.mxu0 %v416_v17  ;;  %v424_v23 = vpack.c.bf16 %v100_v22, %v99_v21  ;;  %v101_v54 = vld [vmem:[%s651_s5 + $0x10] sm:$0xff]  ;;  %v102_v55 = vld [vmem:[%s651_s5 + $0x18] sm:$0xff]  ;;  %v103_v57 = vld [vmem:[%s651_s5 + $0x20] sm:$0xff]  ;;  %p469_p0 = scmp.ne.s32.totalorder %s329_s24, %s468_s25  ;;  %p474_p2 = scmp.lt.s32.totalorder %s468_s25, %s468_s25 }
   0x8   :  { %45 = vadd.xlane.f32.xlu0 %v44_v9  ;;  %90 = vst.msk [vmem:[#allocation3 + $0x8] sm:$0xff] %vm43_vm0, %v42_v8  ;;  %v54_v11 = vmul.f32 %v42_v8, %v42_v8  ;;  %v47_v13 = vsel %vm43_vm0, %v42_v8, 0.0  ;;  %419 = vmatpush3.bf16.msra.mxu0 %v416_v17  ;;  %v428_v56 = vpack.c.bf16 %v102_v55, %v101_v54  ;;  %v104_v58 = vld [vmem:[%s651_s5 + $0x28] sm:$0xff]  ;;  %v105_v60 = vld [vmem:[%s651_s5 + $0x30] sm:$0xff]  ;;  %v106_v61 = vld [vmem:[%s651_s5 + $0x38] sm:$0xff] }
   0x9   :  { %v55_v12 = vsel %vm43_vm0, %v53_v10, 0.0  ;;  %421 = vmatprep.subr.bf16.mxu0 %v420_v20  ;;  %425 = vmatprep.subr.bf16.mxu1 %v424_v23  ;;  %v432_v59 = vpack.c.bf16 %v104_v58, %v103_v57  ;;  %v107_v62 = vld [vmem:[%s651_s5 + $0x40] sm:$0xff]  ;;  %v436_v63 = vpack.c.bf16 %v106_v61, %v105_v60  ;;  %v108_v0 = vld [vmem:[%s651_s5 + $0x48] sm:$0xff]  ;;  %v109_v2 = vld [vmem:[%s651_s5 + $0x50] sm:$0xff]  ;;  %p475_p3 = por %p474_p2, %p473_p1 }
   0xa   :  { %56 = vadd.xlane.f32.xlu1 %v55_v12  ;;  %v58_v14 = vsel %vm43_vm0, %v54_v11, 0.0  ;;  %427 = vmatpush3.bf16.msra.mxu1 %v424_v23  ;;  %v440_v1 = vpack.c.bf16 %v108_v0, %v107_v62  ;;  %v110_v3 = vld [vmem:[%s651_s5 + $0x58] sm:$0xff]  ;;  %v111_v5 = vld [vmem:[%s651_s5 + $0x60] sm:$0xff]  ;;  %v112_v6 = vld [vmem:[%s651_s5 + $0x68] sm:$0xff]  ;;  %v492_v11 = vmov 0.0  }
   0xb   :  { %429 = vmatprep.subr.bf16.mxu1 %v428_v56  ;;  %v444_v4 = vpack.c.bf16 %v110_v3, %v109_v2  ;;  %v114_v9 = vld [vmem:[%s651_s5 + $0x78] sm:$0xff]  ;;  %94 = vst.msk [vmem:[#allocation4 + $0x8] sm:$0xff] %vm43_vm0, %v492_v11  ;;  %93 = vst.msk [vmem:[#allocation4] sm:$0xff] %vm43_vm0, %v492_v11  ;;  %v342_v12 = vld [vmem:[%s650_s4] ss:$0 sm:$0xff]  ;;  %p476_p4 = pnand %p475_p3, %p469_p0 }
   0xc   :  { %48 = vadd.xlane.f32.xlu0 %v47_v13  ;;  %423 = vmatpush3.bf16.msra.mxu0 %v420_v20 }
   0xe   :  { %59 = vadd.xlane.f32.xlu1 %v58_v14  ;;  %431 = vmatpush3.bf16.msra.mxu1 %v428_v56 }
   0xf   :  { %433 = vmatprep.subr.bf16.mxu1 %v432_v59 }
  0x12   :  { %435 = vmatpush3.bf16.msra.mxu1 %v432_v59 }
  0x13   :  { %437 = vmatprep.subr.bf16.mxu1 %v436_v63 }
  0x16   :  { %439 = vmatpush3.bf16.msra.mxu1 %v436_v63 }
  0x17   :  { %441 = vmatprep.subr.bf16.mxu1 %v440_v1 }
  0x1a   :  { %443 = vmatpush3.bf16.msra.mxu1 %v440_v1 }
  0x1b   :  { %445 = vmatprep.subr.bf16.mxu1 %v444_v4 }
  0x1e   :  { %447 = vmatpush3.bf16.msra.mxu1 %v444_v4 }
  0x95   :  { %v46_v24 = vpop.xlane.xlu0 %45 }
  0x96   :  { %v51_v25 = vmul.f32 0.03125, %v46_v24 }
  0x97   :  { %v57_v26 = vpop.xlane.xlu1 %56 }
  0x98   :  { %v63_v27 = vmul.f32 %v51_v25, %v51_v25  ;;  %v61_v28 = vmul.f32 0.03125, %v57_v26  ;;  %v69_v40 = vsub.f32 %v41_v7, %v51_v25  ;;  %v448_v7 = vpack.c.bf16 %v112_v6, %v111_v5 }
  0x99   :  { %v49_v29 = vpop.xlane.xlu0 %48 }
  0x9a   :  { %v65_v30 = vsub.f32 %v61_v28, %v63_v27  ;;  %v52_v31 = vmul.f32 0.03125, %v49_v29  ;;  %449 = vmatprep.subr.bf16.mxu1 %v448_v7 }
  0x9b   :  { %v60_v32 = vpop.xlane.xlu1 %59  ;;  %451 = vmatpush3.bf16.msra.mxu1 %v448_v7 }
  0x9c   :  { %v67_v33 = vmax.f32 %v65_v30, 0.0  ;;  %v64_v34 = vmul.f32 %v52_v31, %v52_v31  ;;  %v62_v35 = vmul.f32 0.03125, %v60_v32  ;;  %v70_v46 = vsub.f32 %v42_v8, %v52_v31  ;;  %v113_v8 = vld [vmem:[%s651_s5 + $0x70] sm:$0xff] }
  0x9d   :  { %v452_v10 = vpack.c.bf16 %v114_v9, %v113_v8 }
  0x9e   :  { %v71_v36 = vadd.f32 1e-12, %v67_v33  ;;  %v66_v37 = vsub.f32 %v62_v35, %v64_v34  ;;  %v225_v35 = vld [vmem:[#allocation4 + $0x8] sm:$0xff] }
  0x9f   :  { %453 = vmatprep.subr.bf16.mxu1 %v452_v10 }
  0xa0   :  { %460 = vrsqrt.f32 %v71_v36  ;;  %v68_v38 = vmax.f32 %v66_v37, 0.0  ;;  %455 = vmatpush3.bf16.msra.mxu1 %v452_v10  ;;  %v224_v36 = vld [vmem:[#allocation4] sm:$0xff] }
  0xa2   :  { %v72_v39 = vadd.f32 1e-12, %v68_v38 }
  0xa4   :  { %462 = vrsqrt.f32 %v72_v39 }
  0xaa   :  { %v461_v41 = vpop.eup %460 }
  0xab   :  { %v75_v43 = vmul.f32 %v461_v41, %v69_v40  ;;  %v312_v41 = vld [vmem:[#allocation3 + $0x8] sm:$0xff] }
  0xad   :  { %v81_v45 = vmul.f32 %v340_v42, %v75_v43  ;;  %v345_v43 = vld [vmem:[%s648_s2 + $0x3] ss:$0 sm:$0xff] }
  0xae   :  { %v463_v47 = vpop.eup %462 }
  0xaf   :  { %v87_v48 = vadd.f32 %v341_v44, %v81_v45  ;;  %v76_v49 = vmul.f32 %v463_v47, %v70_v46 }
  0xb1   :  { %91 = vst.msk [vmem:[#allocation2] sm:$0xff] %vm43_vm0, %v87_v48  ;;  %v82_v50 = vmul.f32 %v340_v42, %v76_v49  ;;  %v311_v42 = vld [vmem:[#allocation3] sm:$0xff] }
  0xb3   :  { %v88_v51 = vadd.f32 %v341_v44, %v82_v50 }
  0xb5   :  { %92 = vst.msk [vmem:[#allocation2 + $0x8] sm:$0xff] %vm43_vm0, %v88_v51 }
  0xb8   :  { %v116_v52 = vld [vmem:[#allocation2] sm:$0xff] }
  0xb9   :  { %378 = vmatprep.mubr.msk.f32.mxu0 %vm43_vm0, %v116_v52 }
  0xbc   :  { %v117_v53 = vld [vmem:[#allocation2 + $0x8] sm:$0xff] }
  0xbd   :  { %379 = vmatmul.mubr.msk.f32.vlgmr.msra.gmra.mrb[0].mxu0 %vm43_vm0, %v117_v53 }
 0x190   :  { %v380_v13 = vpop.f32.mrb[0].mxu0 }
 0x191   :  { %v203_v14 = vadd.f32 %v380_v13, %v342_v12  ;;  %v197_v15 = vpop.f32.mrb[1].mxu0 }
 0x192   :  { %v198_v16 = vadd.f32 %v342_v12, %v197_v15 }
 0x193   :  { %v209_v17 = vmul.f32 0.044715, %v203_v14  ;;  %v207_v32 = vmul.f32 0.5, %v203_v14 }
 0x194   :  { %v208_v18 = vmul.f32 0.044715, %v198_v16  ;;  %v206_v30 = vmul.f32 0.5, %v198_v16 }
 0x195   :  { %v211_v19 = vmul.f32 %v209_v17, %v203_v14 }
 0x196   :  { %v210_v20 = vmul.f32 %v208_v18, %v198_v16 }
 0x197   :  { %v213_v21 = vmul.f32 %v211_v19, %v203_v14 }
 0x198   :  { %v212_v22 = vmul.f32 %v210_v20, %v198_v16 }
 0x199   :  { %v215_v23 = vadd.f32 %v213_v21, %v203_v14 }
 0x19a   :  { %v214_v24 = vadd.f32 %v212_v22, %v198_v16 }
 0x19b   :  { %v217_v25 = vmul.f32 0.7978846, %v215_v23 }
 0x19c   :  { %v216_v26 = vmul.f32 0.7978846, %v214_v24 }
 0x19d   :  { %464 = vtanh.f32 %v217_v25 }
 0x19e   :  { %466 = vtanh.f32 %v216_v26 }
 0x1a7   :  { %v465_v27 = vpop.eup %464 }
 0x1a8   :  { %v467_v28 = vpop.eup %466  ;;  %v221_v29 = vadd.f32 1.0, %v465_v27 }
 0x1a9   :  { %v220_v31 = vadd.f32 1.0, %v467_v28 }
 0x1aa   :  { %v223_v34 = vmul.f32 %v221_v29, %v207_v32 }
 0x1ab   :  { %v222_v33 = vmul.f32 %v220_v31, %v206_v30 }
 0x1ad   :  { %413 = vmatprep.mubr.f32.mxu1 %v222_v33 }
 0x1ae   :  { %414 = vmatmul.mubr.f32.vlgmr.msra.gmra.mrb[0].mxu1 %v223_v34 }
 0x281   :  { %v415_v37 = vpop.f32.mrb[0].mxu1 }
 0x282   :  { %v302_v38 = vadd.f32 %v415_v37, %v225_v35  ;;  %v292_v39 = vpop.f32.mrb[1].mxu1 }
 0x283   :  { %v301_v40 = vadd.f32 %v292_v39, %v224_v36 }
 0x284   :  { %304 = vst.msk [vmem:[#allocation4 + $0x8] sm:$0xff] %vm43_vm0, %v302_v38 }
 0x285   :  { %303 = vst.msk [vmem:[#allocation4] sm:$0xff] %vm43_vm0, %v301_v40 }
 0x28b   :  { %v310_v44 = vld [vmem:[#allocation4 + $0x8] sm:$0xff] }
 0x28c   :  { %v309_v45 = vld [vmem:[#allocation4] sm:$0xff]  ;;  %v314_v46 = vadd.f32 %v312_v41, %v310_v44 }
 0x28d   :  { %v313_v47 = vadd.f32 %v311_v42, %v309_v45 }
 0x28e   :  { %v320_v48 = vadd.f32 %v345_v43, %v314_v46 }
 0x28f   :  { %v319_v49 = vadd.f32 %v345_v43, %v313_v47 }
 0x290   :  { %322 = vst.msk [vmem:[#allocation5 + $0x8] sm:$0xff] %vm43_vm0, %v320_v48 }
 0x291   :  { %321 = vst.msk [vmem:[#allocation5] sm:$0xff] %vm43_vm0, %v319_v49 }
 0x292   :  { %479 = shalt.err (!%p476_p4)
}
 0x293   :  { %s480_s27 = scalar_lea.hbm %s652_s6, 256 }
 0x294   :  { %p481_p5 = scmp.ne.s32.totalorder %s652_s6, %s480_s27  ;;  %p484_p6 = scmp.lt.u32.totalorder %s480_s27, %s652_s6 }
 0x296   :  { %p486_p7 = pnand %p484_p6, %p481_p5 }
 0x298   :  { %489 = shalt.err (!%p486_p7)
}
 0x299   :  { %s494_s1 = smov 128   ;;  %s495_s7 = smov 8  }
 0x29a   :  { %334 = dma.vmem_to_hbm [thread:$0]  %s329_s24, 256, %s652_s6, [#allocation6], %s494_s1, %s494_s1, %s495_s7  }
 0x29b   :  { %490 = dma.done.wait [#allocation6], 256  }
 0x29c   :  { %491 = vsyncadd [#allocation6], 4294967040 }
 0x29d   :  { %338 = vsyncpa [#allocation6], 1 }

</bundles_post_ra>
